<compile_context>
chip_gen: v5e
topology: v5e:2x2
jax: 0.10.0
libtpu: 0.0.40
codegen_flags: <defaults>
</compile_context>

<pallas_src>
import functools
import math

import jax
import jax.numpy as jnp
from jax.experimental import pallas as pl
from jax.experimental.pallas import tpu as pltpu

_LANE = 128


def _cdiv(a: int, b: int) -> int:
    return -(-a // b)


def _round_up(n: int, m: int) -> int:
    return _cdiv(n, m) * m


def _tree_sum(loaders):
    """Sum loaders() using up to 4 independent accumulators (breaks the serial
    add dependence chain so the VALU / vld slots can co-issue)."""
    n_par = min(4, len(loaders))
    accs = [loaders[i]() for i in range(n_par)]
    for i in range(n_par, len(loaders)):
        accs[i % n_par] = accs[i % n_par] + loaders[i]()
    acc = accs[0]
    for a in accs[1:]:
        acc = acc + a
    return acc


def _decomp_kernel(x_ref, res_ref, mean_ref, xpad_ref, *maybe_psum,
                   L: int, k: int, pad: int, k1: int, k2: int):
    # x_ref: (L, T) raw tile.  xpad_ref: (L + 2*pad, T) f32 staging scratch.
    T = x_ref.shape[-1]

    # --- stage an edge-replicated f32 copy of the tile in VMEM scratch -------
    xpad_ref[pl.ds(pad, L), :] = x_ref[...].astype(jnp.float32)
    if pad > 0:
        first = x_ref[pl.ds(0, 1), :].astype(jnp.float32)
        last = x_ref[pl.ds(L - 1, 1), :].astype(jnp.float32)
        xpad_ref[pl.ds(0, pad), :] = jnp.broadcast_to(first, (pad, T))
        xpad_ref[pl.ds(pad + L, pad), :] = jnp.broadcast_to(last, (pad, T))

    # --- sliding-window sum ---------------------------------------------------
    if k2 < 2:
        # direct path: k aligned slice reads, tree-accumulated
        acc = _tree_sum([lambda i=i: xpad_ref[pl.ds(i, L), :] for i in range(k)])
    else:
        # two-level: stride-1 partial sums of k1 rows, then k2 strided reads
        # (k1 is a multiple of 8 -> sublane-aligned psum reads) + remainder.
        psum_ref = maybe_psum[0]
        Lp1 = L + k1 * (k2 - 1)
        psum_ref[...] = _tree_sum(
            [lambda i=i: xpad_ref[pl.ds(i, Lp1), :] for i in range(k1)])
        loaders = ([lambda j=j: psum_ref[pl.ds(j * k1, L), :] for j in range(k2)]
                   + [lambda i=i: xpad_ref[pl.ds(i, L), :] for i in range(k1 * k2, k)])
        acc = _tree_sum(loaders)

    # --- finalize ---------------------------------------------------------------
    mean_q = (acc * (1.0 / k)).astype(mean_ref.dtype)
    mean_ref[...] = mean_q
    x_mid = xpad_ref[pl.ds(pad, L), :]
    res_ref[...] = (x_mid - mean_q.astype(jnp.float32)).astype(res_ref.dtype)


def series_decomp_pallas(x: jax.Array, kernel_size: int):
    """x: (B, L, C).  Returns (res, moving_mean), both (B, L, C)."""
    assert kernel_size >= 1 and kernel_size % 2 == 1, \
        "series_decomp requires an odd kernel_size (matches PyTorch output length)"
    B, L, C = x.shape
    k = kernel_size
    pad = (k - 1) // 2
    Lp = L + 2 * pad
    dtype = x.dtype
    itemsize = jnp.dtype(dtype).itemsize

    # ---- window-sum scheme ---------------------------------------------------
    # Two-level needs k2 >= 2 to reduce the term count; with k1 a multiple of 8
    # (sublane-aligned strided psum reads) that requires k >= 16.
    if k >= 16:
        k1 = max(8, int(round(math.sqrt(k) / 8)) * 8)
        k2 = k // k1
    else:
        k1 = k2 = 0
    psum_rows = (L + k1 * (k2 - 1)) if k2 >= 2 else 0

    # ---- generation-aware tile budget ----------------------------------------
    try:
        vmem_cap = int(pltpu.get_tpu_info().vmem_capacity_bytes)
    except Exception:
        vmem_cap = 64 * 1024 * 1024            # assume the smallest (v7x-class) VMEM
    small_vmem = vmem_cap < 100 * 1024 * 1024  # v7x: 64 MiB per TensorCore
    if small_vmem:
        block_budget, lane_cap, vmem_ceiling = 20 << 20, 512, 48 << 20
    else:                                      # v5e / v6e: 128 MiB VMEM
        block_budget, lane_cap, vmem_ceiling = 48 << 20, 2048, 100 << 20

    # VMEM bytes per lane: double-buffered input + 2 outputs, f32 staging +
    # psum scratch, plus slack for live f32 temporaries.
    per_col = (2 * L * itemsize + 4 * L * itemsize
               + Lp * 4 + psum_rows * 4 + 4 * L * 4)
    max_lanes = max(_LANE, (block_budget // per_col) // _LANE * _LANE)

    fast_path = (C % _LANE == 0)
    lane_dim = C if fast_path else B * C
    lane_tile = min(lane_cap, max_lanes, _round_up(lane_dim, _LANE))

    def total_steps(tile):
        return _cdiv(lane_dim, tile) * (B if fast_path else 1)

    if small_vmem:
        # keep both v7x TensorCores busy: want >= 2 parallel grid steps
        while lane_tile > _LANE and total_steps(lane_tile) < 2:
            lane_tile = max(_LANE, (lane_tile // 2) // _LANE * _LANE)

    est_block = per_col * lane_tile
    vmem_limit = int(min(vmem_ceiling, max(32 << 20, int(1.5 * est_block))))

    # ---- specs ------------------------------------------------------------------
    if fast_path:
        # lane-friendly C: keep (B, L, C), no transpose folds at all
        operand = x
        grid = (B, _cdiv(C, lane_tile))
        in_specs = [pl.BlockSpec((None, L, lane_tile), lambda b, j: (b, 0, j))]
        out_specs = [pl.BlockSpec((None, L, lane_tile), lambda b, j: (b, 0, j))] * 2
        out_shape = (jax.ShapeDtypeStruct((B, L, C), dtype),) * 2
        dim_sem = ("parallel", "parallel")
    else:
        # small C: fold batch into the lane axis (time on sublanes, B*C on lanes)
        N = B * C
        operand = jnp.transpose(x, (1, 0, 2)).reshape(L, N)
        grid = (_cdiv(N, lane_tile),)          # ragged last block is masked by Pallas
        in_specs = [pl.BlockSpec((L, lane_tile), lambda j: (0, j))]
        out_specs = [pl.BlockSpec((L, lane_tile), lambda j: (0, j))] * 2
        out_shape = (jax.ShapeDtypeStruct((L, N), dtype),) * 2
        dim_sem = ("parallel",)

    scratch_shapes = [pltpu.VMEM((Lp, lane_tile), jnp.float32)]
    if k2 >= 2:
        scratch_shapes.append(pltpu.VMEM((psum_rows, lane_tile), jnp.float32))

    kernel = functools.partial(_decomp_kernel, L=L, k=k, pad=pad, k1=k1, k2=k2)

    res_f, mean_f = pl.pallas_call(
        kernel,
        out_shape=out_shape,
        grid_spec=pltpu.PrefetchScalarGridSpec(
            num_scalar_prefetch=0,
            grid=grid,
            in_specs=in_specs,
            out_specs=out_specs,
            scratch_shapes=scratch_shapes,
        ),
        compiler_params=pltpu.CompilerParams(
            dimension_semantics=dim_sem,
            vmem_limit_bytes=vmem_limit,
        ),
    )(operand)

    if fast_path:
        return res_f, mean_f

    def unfold(y):
        return jnp.transpose(y.reshape(L, B, C), (1, 0, 2))

    return unfold(res_f), unfold(mean_f)


def series_decomp_ref(x: jax.Array, kernel_size: int):
    """Pure-JAX reference mirroring the PyTorch forward."""
    pad = (kernel_size - 1) // 2
    front = jnp.repeat(x[:, 0:1, :], pad, axis=1)
    end = jnp.repeat(x[:, -1:, :], pad, axis=1)
    xp = jnp.concatenate([front, x, end], axis=1)               # (B, L + 2*pad, C)
    L = x.shape[1]
    windows = jnp.stack([xp[:, i:i + L, :] for i in range(kernel_size)], axis=0)
    mean = jnp.mean(windows.astype(jnp.float32), axis=0).astype(x.dtype)
    return x - mean, mean


if __name__ == "__main__":
    key = jax.random.PRNGKey(0)
    cases = [
        ((2, 24, 7), 5),      # fold path (small C), direct window sum
        ((2, 24, 7), 25),     # fold path, two-level window sum
        ((2, 32, 128), 5),    # fast path (C % 128 == 0), direct
        ((2, 32, 128), 25),   # fast path, two-level
    ]
    for shape, kernel_size in cases:
        key, sub = jax.random.split(key)
        x = jax.random.normal(sub, shape, dtype=jnp.float32)

        res, mean = series_decomp_pallas(x, kernel_size)
        jax.block_until_ready((res, mean))

        res_r, mean_r = series_decomp_ref(x, kernel_size)
        assert res.shape == x.shape and mean.shape == x.shape
        assert jnp.allclose(mean, mean_r, atol=1e-5, rtol=1e-5), \
            f"moving_mean mismatch (shape={shape}, kernel_size={kernel_size})"
        assert jnp.allclose(res, res_r, atol=1e-5, rtol=1e-5), \
            f"residual mismatch (shape={shape}, kernel_size={kernel_size})"

    print("KERNEL_OK")
</pallas_src>

<mosaic_0001>
module attributes {stable_mosaic.version = 11 : i64} {
  func.func @_decomp_kernel(%arg0: i32, %arg1: memref<24x128xf32, #tpu.memory_space<vmem>>, %arg2: memref<24x128xf32, #tpu.memory_space<vmem>>, %arg3: memref<24x128xf32, #tpu.memory_space<vmem>>, %arg4: memref<28x128xf32, #tpu.memory_space<vmem>>) attributes {dimension_semantics = [#tpu.dimension_semantics<parallel>], iteration_bounds = array<i64: 1>, scalar_prefetch = 0 : i64, scratch_operands = 1 : i64, tpu.core_type = #tpu.core_type<tc>, window_params = [{transform_indices = @transform_0, window_bounds = array<i64: 24, 128>}, {transform_indices = @transform_1, window_bounds = array<i64: 24, 128>}, {transform_indices = @transform_2, window_bounds = array<i64: 24, 128>}]} {
    %c0 = arith.constant 0 : index
    %c0_0 = arith.constant 0 : index
    %0 = vector.load %arg1[%c0, %c0_0] : memref<24x128xf32, #tpu.memory_space<vmem>>, vector<24x128xf32>
    %c2 = arith.constant 2 : index
    %c0_1 = arith.constant 0 : index
    %1 = vector.load %arg4[%c2, %c0_1] : memref<28x128xf32, #tpu.memory_space<vmem>>, vector<24x128xf32>
    tpu.vector_store %arg4[%c2, %c0_1], %0 {strides = array<i32>} : memref<28x128xf32, #tpu.memory_space<vmem>>, vector<24x128xf32>,
    %c0_2 = arith.constant 0 : index
    %c0_3 = arith.constant 0 : index
    %2 = vector.load %arg1[%c0_2, %c0_3] : memref<24x128xf32, #tpu.memory_space<vmem>>, vector<1x128xf32>
    %c23 = arith.constant 23 : index
    %c0_4 = arith.constant 0 : index
    %3 = vector.load %arg1[%c23, %c0_4] : memref<24x128xf32, #tpu.memory_space<vmem>>, vector<1x128xf32>
    %4 = vector.shape_cast %2 : vector<1x128xf32> to vector<1x128xf32>
    %5 = vector.broadcast %4 : vector<1x128xf32> to vector<2x128xf32>
    %c0_5 = arith.constant 0 : index
    %c0_6 = arith.constant 0 : index
    %6 = vector.load %arg4[%c0_5, %c0_6] : memref<28x128xf32, #tpu.memory_space<vmem>>, vector<2x128xf32>
    tpu.vector_store %arg4[%c0_5, %c0_6], %5 {strides = array<i32>} : memref<28x128xf32, #tpu.memory_space<vmem>>, vector<2x128xf32>,
    %7 = vector.shape_cast %3 : vector<1x128xf32> to vector<1x128xf32>
    %8 = vector.broadcast %7 : vector<1x128xf32> to vector<2x128xf32>
    %c26 = arith.constant 26 : index
    %c0_7 = arith.constant 0 : index
    %9 = vector.load %arg4[%c26, %c0_7] : memref<28x128xf32, #tpu.memory_space<vmem>>, vector<2x128xf32>
    tpu.vector_store %arg4[%c26, %c0_7], %8 {strides = array<i32>} : memref<28x128xf32, #tpu.memory_space<vmem>>, vector<2x128xf32>,
    %c0_8 = arith.constant 0 : index
    %c0_9 = arith.constant 0 : index
    %10 = vector.load %arg4[%c0_8, %c0_9] : memref<28x128xf32, #tpu.memory_space<vmem>>, vector<24x128xf32>
    %c1 = arith.constant 1 : index
    %c0_10 = arith.constant 0 : index
    %11 = vector.load %arg4[%c1, %c0_10] : memref<28x128xf32, #tpu.memory_space<vmem>>, vector<24x128xf32>
    %c2_11 = arith.constant 2 : index
    %c0_12 = arith.constant 0 : index
    %12 = vector.load %arg4[%c2_11, %c0_12] : memref<28x128xf32, #tpu.memory_space<vmem>>, vector<24x128xf32>
    %c3 = arith.constant 3 : index
    %c0_13 = arith.constant 0 : index
    %13 = vector.load %arg4[%c3, %c0_13] : memref<28x128xf32, #tpu.memory_space<vmem>>, vector<24x128xf32>
    %c4 = arith.constant 4 : index
    %c0_14 = arith.constant 0 : index
    %14 = vector.load %arg4[%c4, %c0_14] : memref<28x128xf32, #tpu.memory_space<vmem>>, vector<24x128xf32>
    %15 = arith.addf %10, %14 : vector<24x128xf32>
    %16 = arith.addf %15, %11 : vector<24x128xf32>
    %17 = arith.addf %16, %12 : vector<24x128xf32>
    %18 = arith.addf %17, %13 : vector<24x128xf32>
    %cst = arith.constant 2.000000e-01 : f32
    %19 = vector.broadcast %cst : f32 to vector<24x128xf32>
    %20 = arith.mulf %18, %19 : vector<24x128xf32>
    %c0_15 = arith.constant 0 : index
    %c0_16 = arith.constant 0 : index
    %21 = vector.load %arg3[%c0_15, %c0_16] : memref<24x128xf32, #tpu.memory_space<vmem>>, vector<24x128xf32>
    tpu.vector_store %arg3[%c0_15, %c0_16], %20 {strides = array<i32>} : memref<24x128xf32, #tpu.memory_space<vmem>>, vector<24x128xf32>,
    %c2_17 = arith.constant 2 : index
    %c0_18 = arith.constant 0 : index
    %22 = vector.load %arg4[%c2_17, %c0_18] : memref<28x128xf32, #tpu.memory_space<vmem>>, vector<24x128xf32>
    %23 = arith.subf %22, %20 : vector<24x128xf32>
    %c0_19 = arith.constant 0 : index
    %c0_20 = arith.constant 0 : index
    %24 = vector.load %arg2[%c0_19, %c0_20] : memref<24x128xf32, #tpu.memory_space<vmem>>, vector<24x128xf32>
    tpu.vector_store %arg2[%c0_19, %c0_20], %23 {strides = array<i32>} : memref<24x128xf32, #tpu.memory_space<vmem>>, vector<24x128xf32>,
    return
  }
  func.func @transform_0(%arg0: i32) -> (i32, i32) {
    %c0_i32 = arith.constant 0 : i32
    %c0_i32_0 = arith.constant 0 : i32
    return %c0_i32, %arg0 : i32, i32
  }
  func.func @transform_1(%arg0: i32) -> (i32, i32) {
    %c0_i32 = arith.constant 0 : i32
    %c0_i32_0 = arith.constant 0 : i32
    return %c0_i32, %arg0 : i32, i32
  }
  func.func @transform_2(%arg0: i32) -> (i32, i32) {
    %c0_i32 = arith.constant 0 : i32
    %c0_i32_0 = arith.constant 0 : i32
    return %c0_i32, %arg0 : i32, i32
  }
}

</mosaic_0001>

<bundles_post_ra>
// kernel: tpu_custom_call.1
= control target key start
LH: loop header
LB: loop body
LE: loop exit
PB: predicated region body
PF: predicated region fallthrough
CT: control target
= control target key end

     0   :  { %s122_s0 = inlined_call_operand.vmem [shape: f32[24,14], index: 0, kind: input, shape index: {}]   ;;  %s123_s2 = inlined_call_operand.vmem [shape: f32[24,14], index: 2, kind: output, shape index: {1}]   ;;  %s124_s1 = inlined_call_operand.vmem [shape: f32[24,14], index: 1, kind: output, shape index: {0}]  }
   0x1   :  { %v10_v0 = vld [vmem:[%s122_s0] sm:$0xff]  ;;  %v11_v1 = vld [vmem:[%s122_s0 + $0x8] sm:$0xff]  ;;  %v12_v2 = vld [vmem:[%s122_s0 + $0x10] sm:$0xff] }
   0x2   :  { %13 = vst [vmem:[#allocation2 + $0x2] sm:$0xff] %v10_v0  ;;  %v72_v3 = vld [vmem:[%s122_s0] ss:$0 sm:$0xff]  ;;  %v73_v4 = vld [vmem:[%s122_s0 + $0x17] ss:$0 sm:$0xff] }
   0x3   :  { %14 = vst [vmem:[#allocation2 + $0xa] sm:$0xff] %v11_v1 }
   0x4   :  { %15 = vst [vmem:[#allocation2 + $0x12] sm:$0xff] %v12_v2 }
   0x5   :  { %19 = vst [vmem:[#allocation2] sm:$0x3] %v72_v3 }
   0x6   :  { %21 = vst [vmem:[#allocation2 + $0x1a] sm:$0x3] %v73_v4 }
   0xa   :  { %v23_v5 = vld [vmem:[#allocation2 + $0x8] sm:$0xff] }
   0xb   :  { %v26_v6 = vld [vmem:[#allocation2 + $0x9] sm:$0xff]  ;;  %v27_v18 = vld [vmem:[#allocation2 + $0x11] sm:$0xff] }
   0xc   :  { %v35_v7 = vld [vmem:[#allocation2 + $0xc] sm:$0xff]  ;;  %v34_v8 = vld [vmem:[#allocation2 + $0x4] sm:$0xff] }
   0xd   :  { %v38_v9 = vadd.f32 %v35_v7, %v23_v5  ;;  %v22_v10 = vld [vmem:[#allocation2] sm:$0xff]  ;;  %v24_v11 = vld [vmem:[#allocation2 + $0x10] sm:$0xff] }
   0xe   :  { %v37_v12 = vadd.f32 %v34_v8, %v22_v10  ;;  %v36_v13 = vld [vmem:[#allocation2 + $0x14] sm:$0xff]  ;;  %v25_v15 = vld [vmem:[#allocation2 + $0x1] sm:$0xff]  ;;  %v32_v21 = vld [vmem:[#allocation2 + $0xb] sm:$0xff] }
   0xf   :  { %v41_v14 = vadd.f32 %v38_v9, %v26_v6  ;;  %v39_v16 = vadd.f32 %v36_v13, %v24_v11  ;;  %v31_v24 = vld [vmem:[#allocation2 + $0x3] sm:$0xff]  ;;  %v33_v27 = vld [vmem:[#allocation2 + $0x13] sm:$0xff] }
  0x10   :  { %v40_v17 = vadd.f32 %v37_v12, %v25_v15 }
  0x11   :  { %v44_v19 = vadd.f32 %v41_v14, %v11_v1  ;;  %v42_v20 = vadd.f32 %v39_v16, %v27_v18 }
  0x12   :  { %v43_v22 = vadd.f32 %v40_v17, %v10_v0 }
  0x13   :  { %v47_v23 = vadd.f32 %v44_v19, %v32_v21  ;;  %v45_v25 = vadd.f32 %v42_v20, %v12_v2 }
  0x14   :  { %v46_v26 = vadd.f32 %v43_v22, %v31_v24 }
  0x15   :  { %v50_v28 = vmul.f32 0.2, %v47_v23  ;;  %v48_v29 = vadd.f32 %v45_v25, %v33_v27 }
  0x16   :  { %v49_v30 = vmul.f32 0.2, %v46_v26 }
  0x17   :  { %53 = vst [vmem:[%s123_s2 + $0x8] sm:$0xff] %v50_v28  ;;  %v51_v31 = vmul.f32 0.2, %v48_v29  ;;  %v59_v32 = vsub.f32 %v11_v1, %v50_v28 }
  0x18   :  { %52 = vst [vmem:[%s123_s2] sm:$0xff] %v49_v30  ;;  %v58_v33 = vsub.f32 %v10_v0, %v49_v30 }
  0x19   :  { %54 = vst [vmem:[%s123_s2 + $0x10] sm:$0xff] %v51_v31  ;;  %v60_v34 = vsub.f32 %v12_v2, %v51_v31 }
  0x1a   :  { %62 = vst [vmem:[%s124_s1 + $0x8] sm:$0xff] %v59_v32 }
  0x1b   :  { %61 = vst [vmem:[%s124_s1] sm:$0xff] %v58_v33 }
  0x1c   :  { %63 = vst [vmem:[%s124_s1 + $0x10] sm:$0xff] %v60_v34 }

</bundles_post_ra>
